<compile_context>
chip_gen: v7x
topology: tpu7x:2x2x1
jax: 0.10.0
libtpu: 0.0.40
codegen_flags: <defaults>
</compile_context>

<pallas_src>
import functools

import jax
import jax.numpy as jnp
from jax.experimental import pallas as pl
from jax.experimental.pallas import tpu as pltpu


def _round_up(x, m):
    return ((x + m - 1) // m) * m


def _vmem_budget():
    """(usable budget for tile fitting, physical per-core VMEM capacity)."""
    cap = 64 << 20  # conservative fallback = v7x per-TC VMEM
    try:
        info = pltpu.get_tpu_info()
        cap = int(getattr(info, "vmem_capacity_bytes", cap))
    except Exception:
        pass
    return int(0.75 * cap), cap


def _tile_footprint(tm, tn, tk, out_itemsize, k_tiled):
    """Per-grid-step VMEM bytes (double-buffered inputs/outputs + scratch)."""
    f = 2 * 2 * (tm * tk + tk * tn)      # bf16 x / w tiles, 2 buffers each
    f += 2 * 4 * tn                       # f32 bias tile
    f += 2 * out_itemsize * tm * tn       # output tile
    if k_tiled:
        f += 4 * tm * tn                  # f32 accumulator scratch
    return f


def _select_tiles(M, D, V, out_itemsize, budget):
    """Returns (tm, tn, tk, k_tiled)."""
    Vp = _round_up(V, 128)

    # Lane-dense vocab tile from power-of-two divisors of Vp (no extra V pad).
    tn_pref = 128
    for cand in (1024, 512, 256, 128):
        if cand <= Vp and Vp % cand == 0:
            tn_pref = cand
            break

    # Row tile: multiple of 16 (bf16 packs 2 rows/sublane), up to 1024, then
    # re-balanced so the M padding is minimal.
    tm_pref = min(1024, _round_up(M, 16))
    if M > tm_pref:
        nblk = -(-M // tm_pref)
        tm_pref = _round_up(-(-M // nblk), 16)

    # --- 1) Prefer whole-K blocks: x resident across the vocab sweep. ---
    tn_min = 256 if (Vp >= 256 and Vp % 256 == 0) else 128
    tm_min = min(tm_pref, 512)
    tm, tn = tm_pref, tn_pref
    while _tile_footprint(tm, tn, D, out_itemsize, False) > budget:
        if tn > tn_min:
            tn //= 2
        elif tm > tm_min:
            tm = max(tm_min, _round_up(tm // 2, 16))
        else:
            break
    if _tile_footprint(tm, tn, D, out_itemsize, False) <= budget:
        return tm, tn, D, False

    # --- 2) Fallback: tile K with an f32 accumulator (very large d_model). ---
    tm, tn = tm_pref, tn_pref
    tk = _round_up(D, 128)
    while _tile_footprint(tm, tn, tk, out_itemsize, True) > budget:
        if tk > 512:
            tk = _round_up(tk // 2, 128)
        elif tn > 128:
            tn //= 2
        elif tm > 128:
            tm = max(128, _round_up(tm // 2, 16))
        else:
            break
    return tm, tn, tk, True


# ----------------------------- kernels --------------------------------------


def _proj_kernel_fused(x_ref, w_ref, b_ref, o_ref):
    # Whole-K path: x_ref (tm, D) bf16, w_ref (D, tn) bf16, b_ref (1, tn) f32.
    o_ref[...] = (
        jnp.dot(x_ref[...], w_ref[...], preferred_element_type=jnp.float32)
        + b_ref[...]
    ).astype(o_ref.dtype)


def _proj_kernel_kacc(x_ref, w_ref, b_ref, o_ref, acc_ref):
    # K-tiled path: f32 accumulator resident across the (last) K grid axis.
    k = pl.program_id(2)

    @pl.when(k == 0)
    def _():
        acc_ref[...] = jnp.zeros_like(acc_ref)

    acc_ref[...] += jnp.dot(
        x_ref[...], w_ref[...], preferred_element_type=jnp.float32
    )

    @pl.when(k == pl.num_programs(2) - 1)
    def _():
        o_ref[...] = (acc_ref[...] + b_ref[...]).astype(o_ref.dtype)


# ----------------------------- wrappers --------------------------------------


def prepare_projection_params(w_t, b):
    """One-time prep: bf16 weight + f32 bias, vocab padded to a 128 multiple.

    w_t: (d_model, vocab_size)  (transposed PyTorch weight)
    b:   (vocab_size,)
    """
    D, V = w_t.shape
    Vp = _round_up(V, 128)
    w_p = w_t.astype(jnp.bfloat16)
    b_p = b.astype(jnp.float32).reshape(1, V)
    if Vp != V:
        w_p = jnp.pad(w_p, ((0, 0), (0, Vp - V)))
        b_p = jnp.pad(b_p, ((0, 0), (0, Vp - V)))
    return w_p, b_p


@functools.partial(jax.jit, static_argnames=("vocab_size",))
def projection_apply(x, w_prep, b_prep, vocab_size):
    """y = x @ w_t + b, hot path with pre-prepared (bf16, padded) weights.

    x:      (batch, seq, d_model)
    w_prep: (d_model, Vp) bf16
    b_prep: (1, Vp) f32
    returns (batch, seq, vocab_size) in x.dtype
    """
    B, S, D = x.shape
    Dw, Vp = w_prep.shape
    assert Dw == D
    V = vocab_size
    M = B * S
    out_dtype = x.dtype
    out_itemsize = jnp.dtype(out_dtype).itemsize

    budget, vmem_cap = _vmem_budget()
    tm, tn, tk, k_tiled = _select_tiles(M, D, V, out_itemsize, budget)

    # Activations: bf16 for the MXU, pad rows to a multiple of tm.
    Mp = _round_up(M, tm)
    x2 = x.reshape(M, D).astype(jnp.bfloat16)
    if Mp != M:
        x2 = jnp.pad(x2, ((0, Mp - M), (0, 0)))

    w2 = w_prep
    b2 = b_prep

    footprint = _tile_footprint(tm, tn, tk, out_itemsize, k_tiled)
    vmem_limit = int(min(0.9 * vmem_cap, max(32 << 20, 2 * footprint)))

    cost = pl.CostEstimate(
        flops=2 * M * D * V,
        transcendentals=0,
        bytes_accessed=M * D * 2 + D * Vp * 2 + Vp * 4 + M * V * out_itemsize,
    )

    if not k_tiled:
        # Whole d_model in one block: x block is resident across the vocab (j)
        # sweep (index stays (i, 0)); no accumulator, no D padding.
        grid = (Mp // tm, Vp // tn)
        out = pl.pallas_call(
            _proj_kernel_fused,
            out_shape=jax.ShapeDtypeStruct((Mp, Vp), out_dtype),
            grid_spec=pltpu.PrefetchScalarGridSpec(
                num_scalar_prefetch=0,
                grid=grid,
                in_specs=[
                    pl.BlockSpec((tm, D), lambda i, j: (i, 0)),   # x rows (resident over j)
                    pl.BlockSpec((D, tn), lambda i, j: (0, j)),   # weight cols
                    pl.BlockSpec((1, tn), lambda i, j: (0, j)),   # bias slice
                ],
                out_specs=pl.BlockSpec((tm, tn), lambda i, j: (i, j)),
            ),
            compiler_params=pltpu.CompilerParams(
                dimension_semantics=("parallel", "parallel"),
                vmem_limit_bytes=vmem_limit,
            ),
            cost_estimate=cost,
        )(x2, w2, b2)
    else:
        # Very large d_model: tile K, keep an f32 accumulator resident.
        Dp = _round_up(D, tk)
        if Dp != D:
            x2 = jnp.pad(x2, ((0, 0), (0, Dp - D)))
            w2 = jnp.pad(w2, ((0, Dp - D), (0, 0)))
        grid = (Mp // tm, Vp // tn, Dp // tk)
        out = pl.pallas_call(
            _proj_kernel_kacc,
            out_shape=jax.ShapeDtypeStruct((Mp, Vp), out_dtype),
            grid_spec=pltpu.PrefetchScalarGridSpec(
                num_scalar_prefetch=0,
                grid=grid,
                in_specs=[
                    pl.BlockSpec((tm, tk), lambda i, j, k: (i, k)),
                    pl.BlockSpec((tk, tn), lambda i, j, k: (k, j)),
                    pl.BlockSpec((1, tn), lambda i, j, k: (0, j)),
                ],
                out_specs=pl.BlockSpec((tm, tn), lambda i, j, k: (i, j)),
                scratch_shapes=[pltpu.VMEM((tm, tn), jnp.float32)],
            ),
            compiler_params=pltpu.CompilerParams(
                dimension_semantics=("parallel", "parallel", "arbitrary"),
                vmem_limit_bytes=vmem_limit,
            ),
            cost_estimate=cost,
        )(x2, w2, b2)

    return out[:M, :V].reshape(B, S, V)


def projection_layer(x, w_t, b):
    """Convenience path: prep weights (once per call here) then apply."""
    w_prep, b_prep = prepare_projection_params(w_t, b)
    return projection_apply(x, w_prep, b_prep, vocab_size=w_t.shape[1])


if __name__ == "__main__":
    # Small shapes consistent with the module's forward:
    # (batch, seq, d_model) -> (batch, seq, vocab_size)
    batch, seq, d_model, vocab_size = 2, 8, 32, 128

    key = jax.random.PRNGKey(0)
    kx, kw, kb = jax.random.split(key, 3)

    x = jax.random.normal(kx, (batch, seq, d_model), dtype=jnp.float32)

    # Deterministic init mimicking nn.Linear default:
    # uniform(-1/sqrt(fan_in), 1/sqrt(fan_in)), PyTorch layout (out, in).
    bound = 1.0 / (d_model ** 0.5)
    weight = jax.random.uniform(kw, (vocab_size, d_model), minval=-bound,
                                maxval=bound, dtype=jnp.float32)
    bias = jax.random.uniform(kb, (vocab_size,), minval=-bound, maxval=bound,
                              dtype=jnp.float32)

    w_t = weight.T  # (d_model, vocab_size)

    # Persistent weight prep (done once), then the hot-path apply.
    w_prep, b_prep = prepare_projection_params(w_t, bias)
    y = projection_apply(x, w_prep, b_prep, vocab_size=vocab_size)
    jax.block_until_ready(y)

    # Reference with matching bf16-input / f32-accumulate math.
    x2 = x.reshape(batch * seq, d_model).astype(jnp.bfloat16)
    y_ref = (jnp.dot(x2, w_t.astype(jnp.bfloat16),
                     preferred_element_type=jnp.float32) + bias)
    y_ref = y_ref.reshape(batch, seq, vocab_size).astype(x.dtype)

    assert y.shape == (batch, seq, vocab_size)
    assert jnp.allclose(y, y_ref, atol=1e-2, rtol=1e-2)
    # Loose check against full-f32 reference (bf16 input rounding only).
    assert jnp.allclose(y, x @ weight.T + bias, atol=5e-2, rtol=5e-2)

    print("KERNEL_OK")
</pallas_src>

<mosaic_0001>
module attributes {stable_mosaic.version = 11 : i64} {
  func.func @_proj_kernel_fused(%arg0: i32, %arg1: i32, %arg2: memref<16x32xbf16, #tpu.memory_space<vmem>>, %arg3: memref<32x128xbf16, #tpu.memory_space<vmem>>, %arg4: memref<1x128xf32, #tpu.memory_space<vmem>>, %arg5: memref<16x128xf32, #tpu.memory_space<vmem>>) attributes {dimension_semantics = [#tpu.dimension_semantics<parallel>, #tpu.dimension_semantics<parallel>], iteration_bounds = array<i64: 1, 1>, scalar_prefetch = 0 : i64, scratch_operands = 0 : i64, tpu.core_type = #tpu.core_type<tc>, window_params = [{transform_indices = @transform_0, window_bounds = array<i64: 16, 32>}, {transform_indices = @transform_1, window_bounds = array<i64: 32, 128>}, {transform_indices = @transform_2, window_bounds = array<i64: 1, 128>}, {transform_indices = @transform_3, window_bounds = array<i64: 16, 128>}]} {
    %c0 = arith.constant 0 : index
    %c0_0 = arith.constant 0 : index
    %0 = vector.load %arg2[%c0, %c0_0] : memref<16x32xbf16, #tpu.memory_space<vmem>>, vector<16x32xbf16>
    %c0_1 = arith.constant 0 : index
    %c0_2 = arith.constant 0 : index
    %1 = vector.load %arg3[%c0_1, %c0_2] : memref<32x128xbf16, #tpu.memory_space<vmem>>, vector<32x128xbf16>
    %cst = arith.constant dense<0.000000e+00> : vector<16x128xf32>
    %2 = tpu.matmul %0, %1, %cst {dimension_numbers = #tpu.dot_dimension_numbers<[1], [0], [0], [1], [0, 0, 1, 1], [], []>} : vector<16x32xbf16>, vector<32x128xbf16>, vector<16x128xf32> -> vector<16x128xf32>
    %c0_3 = arith.constant 0 : index
    %c0_4 = arith.constant 0 : index
    %3 = vector.load %arg4[%c0_3, %c0_4] : memref<1x128xf32, #tpu.memory_space<vmem>>, vector<1x128xf32>
    %4 = vector.broadcast %3 : vector<1x128xf32> to vector<16x128xf32>
    %5 = arith.addf %2, %4 : vector<16x128xf32>
    %c0_5 = arith.constant 0 : index
    %c0_6 = arith.constant 0 : index
    %6 = vector.load %arg5[%c0_5, %c0_6] : memref<16x128xf32, #tpu.memory_space<vmem>>, vector<16x128xf32>
    tpu.vector_store %arg5[%c0_5, %c0_6], %5 {strides = array<i32>} : memref<16x128xf32, #tpu.memory_space<vmem>>, vector<16x128xf32>,
    return
  }
  func.func @transform_0(%arg0: i32, %arg1: i32) -> (i32, i32) {
    %c0_i32 = arith.constant 0 : i32
    %c0_i32_0 = arith.constant 0 : i32
    return %arg0, %c0_i32 : i32, i32
  }
  func.func @transform_1(%arg0: i32, %arg1: i32) -> (i32, i32) {
    %c0_i32 = arith.constant 0 : i32
    %c0_i32_0 = arith.constant 0 : i32
    return %c0_i32, %arg1 : i32, i32
  }
  func.func @transform_2(%arg0: i32, %arg1: i32) -> (i32, i32) {
    %c0_i32 = arith.constant 0 : i32
    %c0_i32_0 = arith.constant 0 : i32
    return %c0_i32, %arg1 : i32, i32
  }
  func.func @transform_3(%arg0: i32, %arg1: i32) -> (i32, i32) {
    %c0_i32 = arith.constant 0 : i32
    return %arg0, %arg1 : i32, i32
  }
}

</mosaic_0001>

<bundles_post_ra>
// kernel: projection_apply.1
= control target key start
LH: loop header
LB: loop body
LE: loop exit
PB: predicated region body
PF: predicated region fallthrough
CT: control target
= control target key end

     0   :  { %v157_v1 = vmov 0.0   ;;  %vm158_vm0 = vmmov 0   ;;  %s206_s0 = inlined_call_operand.vmem [shape: bf16[16,32], index: 0, kind: input, shape index: {}]   ;;  %s207_s1 = inlined_call_operand.vmem [shape: bf16[32,128], index: 1, kind: input, shape index: {}]   ;;  %s208_s2 = inlined_call_operand.vmem [shape: f32[1,128], index: 2, kind: input, shape index: {}]   ;;  %s209_s3 = inlined_call_operand.hbm [shape: f32[16,128], index: 3, kind: output, shape index: {}]  }
   0x1   :  { %v130_v0 = vld [vmem:[%s207_s1] sm:$0xff]   ;;  %117 = vmatprep.subr.bf16.mxu0 %v157_v1  ;;  %v131_v2 = vld [vmem:[%s207_s1 + $0x8] sm:$0xff]   ;;  %121 = vmatprep.mubr.msk.bf16.mxu0 %vm158_vm0, %v157_v1 }
   0x2   :  { %118 = vmatpush3.bf16.msra.mxu0 %v130_v0 }
   0x3   :  { %119 = vmatprep.subr.bf16.mxu0 %v157_v1 }
   0x4   :  { %8 = vsyncpa [#allocation3], 0  ;;  %v132_v3 = vld [vmem:[%s206_s0] sm:$0xff]   ;;  %vm46_vm1 = vcmask 261120   ;;  %s159_s20 = smov [#allocation2]  }
   0x5   :  { %v109_v4 = vld [vmem:[%s208_s2] ss:$0 sm:$0xff]  ;;  %s98_s21 = sshll.u32 %s159_s20, 4  ;;  %s99_s21 = int_to_ptr.vmem [resolvable:$true] %s98_s21 }
   0x6   :  { %120 = vmatpush3.bf16.msra.mxu0 %v131_v2  ;;  %s133_s1 = scalar_lea.vmem %s99_s21, 256  ;;  %p138_p1 = scmp.lt.s32.totalorder %s99_s21, %s99_s21 }
   0x7   :  { %p134_p0 = scmp.ne.s32.totalorder %s99_s21, %s133_s1  ;;  %p139_p2 = scmp.lt.s32.totalorder %s133_s1, %s133_s1 }
   0x9   :  { %122 = vmatmul.mubr.msk.bf16.vlgmr.msra.gmra.mrb[0].mxu0 %vm46_vm1, %v132_v3  ;;  %p140_p3 = por %p139_p2, %p138_p1 }
   0xb   :  { %p141_p4 = pnand %p140_p3, %p134_p0 }
  0xdc   :  { %v84_v5 = vpop.f32.mrb[0].mxu0 }
  0xdd   :  { %v85_v6 = vadd.f32 %v109_v4, %v84_v5  ;;  %v123_v7 = vpop.f32.mrb[1].mxu0 }
  0xde   :  { %v87_v8 = vpop.f32.mrb[2].mxu0 }
  0xdf   :  { %91 = vst [vmem:[#allocation2] sm:$0xff] %v85_v6  ;;  %v88_v9 = vadd.f32 %v109_v4, %v87_v8  ;;  %v124_v10 = vpop.f32.mrb[3].mxu0 }
  0xe1   :  { %92 = vst [vmem:[#allocation2 + $0x8] sm:$0xff] %v88_v9 }
  0xe2   :  { %144 = shalt.err (!%p141_p4)
}
  0xe3   :  { %s145_s22 = scalar_lea.hbm %s209_s3, 256 }
  0xe4   :  { %p146_p5 = scmp.ne.s32.totalorder %s209_s3, %s145_s22  ;;  %p149_p6 = scmp.lt.u32.totalorder %s145_s22, %s209_s3 }
  0xe6   :  { %p151_p7 = pnand %p149_p6, %p146_p5 }
  0xe8   :  { %154 = shalt.err (!%p151_p7)
}
  0xe9   :  { %s160_s27 = smov 128   ;;  %s161_s28 = smov 8  }
  0xea   :  { %104 = dma.vmem_to_hbm [thread:$0]  %s99_s21, 256, %s209_s3, [#allocation3], %s160_s27, %s160_s27, %s161_s28  }
  0xeb   :  { %155 = dma.done.wait [#allocation3], 256  }
  0xec   :  { %156 = vsyncadd [#allocation3], 4294967040 }
  0xed   :  { %108 = vsyncpa [#allocation3], 1 }

</bundles_post_ra>
